<compile_context>
chip_gen: v7x
topology: tpu7x:2x2x1
jax: 0.10.0
libtpu: 0.0.40
codegen_flags: <defaults>
</compile_context>

<pallas_src>
import jax
import jax.numpy as jnp
from jax.experimental import pallas as pl
from jax.experimental.pallas import tpu as pltpu

LANES = 128        # lane width of a vreg
DEFAULT_TM = 2048  # sublane rows per grid step (1 MiB f32 per stream per step)
NUM_CORES = 2      # leading "parallel" grid axis; uses both TCs on v7x


def _pow_static(x, p):
    """x ** p with a *static* Python exponent.

    Small non-negative integer exponents become repeated multiplies (VPU);
    anything else falls back to jnp.power with a constant float exponent (EUP).
    """
    pf = float(p)
    if pf == int(pf) and 0 <= int(pf) <= 16:
        n = int(pf)
        if n == 0:
            return jnp.ones_like(x)
        acc = None
        base = x
        while n:
            if n & 1:
                acc = base if acc is None else acc * base
            n >>= 1
            if n:
                base = base * base
        return acc
    return jnp.power(x, jnp.float32(pf))


def _make_focal_kernel(alpha, beta, tm, rows, tiles_per_core, n_full_blocks,
                       need_mask):
    """Build the kernel body. All shape/grid parameters are static Python ints."""

    def kernel(o_ref, t_ref, out_ref):
        c = pl.program_id(0)   # core / row-range partition (parallel)
        i = pl.program_id(1)   # row-block within this core's range (arbitrary)

        @pl.when(i == 0)
        def _():
            out_ref[...] = jnp.zeros_like(out_ref)

        o = o_ref[...].astype(jnp.float32)
        t = t_ref[...].astype(jnp.float32)

        def accumulate(valid):
            pos = t == 1.0
            neg = t < 1.0
            if valid is not None:
                # select-before-accumulate: masked lanes can never poison sums.
                pos = jnp.logical_and(pos, valid)
                neg = jnp.logical_and(neg, valid)
            one_m_o = 1.0 - o
            # Single transcendental per element: log of the selected operand.
            lg = jnp.log(jnp.where(pos, o, one_m_o))
            pos_term = lg * _pow_static(one_m_o, alpha)
            neg_term = (lg * _pow_static(o, alpha)
                        * _pow_static(1.0 - t, beta))
            loss = jnp.where(pos, pos_term, jnp.where(neg, neg_term, 0.0))
            cnt = jnp.where(pos, 1.0, 0.0)
            # Fold (tm,128) -> (8,128): sublane-aligned reshape (no retiling),
            # pure VALU adds; then a single tiny accumulator update.
            out_ref[0, 0, :, :] += loss.reshape(tm // 8, 8, LANES).sum(axis=0)
            out_ref[0, 1, :, :] += cnt.reshape(tm // 8, 8, LANES).sum(axis=0)

        if not need_mask:
            # Every block this kernel ever sees lies fully inside `rows`.
            accumulate(None)
        else:
            gb = c * tiles_per_core + i   # intended (unclamped) global block

            @pl.when(gb < n_full_blocks)
            def _():
                accumulate(None)          # fast path: no mask work

            @pl.when(gb >= n_full_blocks)
            def _():
                # Partial (or fully out-of-range, index-clamped) block:
                # mask rows beyond the real array extent.
                row = jax.lax.broadcasted_iota(jnp.int32, (tm, LANES), 0)
                valid = (gb * tm + row) < rows
                accumulate(valid)

    return kernel


def focal_loss(out, target, alpha, beta, *, tm=DEFAULT_TM):
    """Pallas implementation of FocalLoss.forward(out, target, alpha, beta).

    alpha/beta must be static Python scalars (as at the PyTorch call site).
    """
    assert out.shape == target.shape
    alpha = float(alpha)
    beta = float(beta)

    total = out.size
    out_flat = jnp.ravel(out)      # keep original dtype; cast in-kernel
    tgt_flat = jnp.ravel(target)

    n_main = (total // LANES) * LANES
    if n_main != total:
        # <=127-element tail summed in plain JAX: avoids re-materializing the
        # whole flattened arrays just to pad them to a lane multiple.
        to = out_flat[n_main:].astype(jnp.float32)
        tt = tgt_flat[n_main:].astype(jnp.float32)
        pos_t = tt == 1.0
        neg_t = tt < 1.0
        lg = jnp.log(jnp.where(pos_t, to, 1.0 - to))
        p_term = lg * _pow_static(1.0 - to, alpha)
        n_term = lg * _pow_static(to, alpha) * _pow_static(1.0 - tt, beta)
        tail_loss = jnp.sum(jnp.where(pos_t, p_term, jnp.where(neg_t, n_term, 0.0)))
        tail_cnt = jnp.sum(pos_t.astype(jnp.float32))
        out_flat = out_flat[:n_main]
        tgt_flat = tgt_flat[:n_main]
    else:
        tail_loss = jnp.float32(0.0)
        tail_cnt = jnp.float32(0.0)

    rows = n_main // LANES
    if rows == 0:
        loss_sum = tail_loss
        num_pos = tail_cnt
    else:
        out2 = out_flat.reshape(rows, LANES)   # free when total is lane-aligned
        tgt2 = tgt_flat.reshape(rows, LANES)

        # tm: multiple of 8 (for the sublane fold and the (8,128) tiling rule),
        # capped at the row count rounded up to 8.
        tm = min(tm, -(-rows // 8) * 8)
        n_tiles = -(-rows // tm)               # total row blocks
        nc = NUM_CORES if n_tiles >= NUM_CORES else 1
        tpc = -(-n_tiles // nc)                # row blocks per core
        n_full = rows // tm                    # blocks fully inside `rows`
        need_mask = (nc * tpc) > n_full        # any partial / out-of-range block
        last_block = n_tiles - 1

        kernel = _make_focal_kernel(alpha, beta, tm, rows, tpc, n_full, need_mask)

        def in_map(c, i):
            # Clamp so a core's trailing (fully out-of-range) steps re-read the
            # last valid block; their contribution is masked to zero in-kernel.
            return (jnp.minimum(c * tpc + i, last_block), 0)

        res = pl.pallas_call(
            kernel,
            out_shape=jax.ShapeDtypeStruct((nc, 2, 8, LANES), jnp.float32),
            grid=(nc, tpc),
            in_specs=[
                pl.BlockSpec((tm, LANES), in_map),   # out
                pl.BlockSpec((tm, LANES), in_map),   # target
            ],
            # Per-core partial sums: [core, {loss, count}, 8, 128]; the block is
            # resident in VMEM across the reduction axis (accumulator pattern).
            out_specs=pl.BlockSpec((1, 2, 8, LANES), lambda c, i: (c, 0, 0, 0)),
            compiler_params=pltpu.CompilerParams(
                dimension_semantics=("parallel", "arbitrary")),
        )(out2, tgt2)

        loss_sum = jnp.sum(res[:, 0]) + tail_loss
        num_pos = jnp.sum(res[:, 1]) + tail_cnt

    # Matches the PyTorch branch: -neg_loss if num_pos == 0 else
    # -(pos_loss + neg_loss) / num_pos.  (pos_loss == 0 exactly when
    # num_pos == 0, so the merged sum is correct in both branches.)
    return jnp.where(num_pos == 0.0, -loss_sum, -loss_sum / num_pos)


def focal_loss_ref(out, target, alpha, beta):
    """Plain-JAX reference with identical semantics (for verification)."""
    out = out.astype(jnp.float32)
    target = target.astype(jnp.float32)
    pos_inds = (target == 1.0).astype(jnp.float32)
    neg_inds = (target < 1.0).astype(jnp.float32)
    pos_loss = jnp.log(out) * jnp.power(1.0 - out, alpha) * pos_inds
    neg_loss = (jnp.log(1.0 - out) * jnp.power(out, alpha)
                * jnp.power(1.0 - target, beta) * neg_inds)
    num_pos = pos_inds.sum()
    pos_loss = pos_loss.sum()
    neg_loss = neg_loss.sum()
    return jnp.where(num_pos == 0.0, -neg_loss, -(pos_loss + neg_loss) / num_pos)


if __name__ == "__main__":
    key = jax.random.PRNGKey(0)
    k_out, k_tgt = jax.random.split(key)

    B, C, H, W = 2, 4, 16, 16   # NCHW, like the PyTorch module's (batch, c, h, w)

    # Predicted heatmap: strictly inside (0, 1) via sigmoid of small normals.
    out = jax.nn.sigmoid(0.5 * jax.random.normal(k_out, (B, C, H, W), jnp.float32))
    # Target heatmap: values in [0, 1), with a sparse set of exact 1.0 peaks.
    target = jax.random.uniform(k_tgt, (B, C, H, W), jnp.float32, 0.0, 0.999)
    target = target.at[:, :, ::8, ::8].set(1.0)

    alpha, beta = 2.0, 4.0

    loss = jax.block_until_ready(focal_loss(out, target, alpha, beta))
    ref = jax.block_until_ready(focal_loss_ref(out, target, alpha, beta))

    assert jnp.isfinite(loss), f"non-finite loss: {loss}"
    assert jnp.allclose(loss, ref, rtol=1e-5, atol=1e-5), (loss, ref)
    print("KERNEL_OK")
</pallas_src>

<mosaic_0001>
module attributes {stable_mosaic.version = 11 : i64} {
  func.func @kernel(%arg0: i32, %arg1: i32, %arg2: memref<16x128xf32, #tpu.memory_space<vmem>>, %arg3: memref<16x128xf32, #tpu.memory_space<vmem>>, %arg4: memref<1x2x8x128xf32, #tpu.memory_space<vmem>>) attributes {dimension_semantics = [#tpu.dimension_semantics<parallel>, #tpu.dimension_semantics<arbitrary>], iteration_bounds = array<i64: 1, 1>, scalar_prefetch = 0 : i64, scratch_operands = 0 : i64, tpu.core_type = #tpu.core_type<tc>, window_params = [{transform_indices = @transform_0, window_bounds = array<i64: 16, 128>}, {transform_indices = @transform_1, window_bounds = array<i64: 16, 128>}, {transform_indices = @transform_2, window_bounds = array<i64: 1, 2, 8, 128>}]} {
    %c0_i32 = arith.constant 0 : i32
    %0 = arith.cmpi eq, %arg1, %c0_i32 : i32
    %1 = arith.extui %0 : i1 to i32
    %c0_i32_0 = arith.constant 0 : i32
    %2 = arith.cmpi ne, %1, %c0_i32_0 : i32
    scf.if %2 {
      %cst_27 = arith.constant 0.000000e+00 : f32
      %44 = vector.broadcast %cst_27 : f32 to vector<1x2x8x128xf32>
      %c0_28 = arith.constant 0 : index
      %c0_29 = arith.constant 0 : index
      %c0_30 = arith.constant 0 : index
      %c0_31 = arith.constant 0 : index
      %45 = vector.load %arg4[%c0_28, %c0_29, %c0_30, %c0_31] : memref<1x2x8x128xf32, #tpu.memory_space<vmem>>, vector<1x2x8x128xf32>
      tpu.vector_store %arg4[%c0_28, %c0_29, %c0_30, %c0_31], %44 {strides = array<i32>} : memref<1x2x8x128xf32, #tpu.memory_space<vmem>>, vector<1x2x8x128xf32>,
    } else {
    }
    %c0 = arith.constant 0 : index
    %c0_1 = arith.constant 0 : index
    %3 = vector.load %arg2[%c0, %c0_1] : memref<16x128xf32, #tpu.memory_space<vmem>>, vector<16x128xf32>
    %c0_2 = arith.constant 0 : index
    %c0_3 = arith.constant 0 : index
    %4 = vector.load %arg3[%c0_2, %c0_3] : memref<16x128xf32, #tpu.memory_space<vmem>>, vector<16x128xf32>
    %cst = arith.constant 1.000000e+00 : f32
    %5 = vector.broadcast %cst : f32 to vector<16x128xf32>
    %6 = arith.cmpf oeq, %4, %5 : vector<16x128xf32>
    %cst_4 = arith.constant 1.000000e+00 : f32
    %7 = vector.broadcast %cst_4 : f32 to vector<16x128xf32>
    %8 = arith.cmpf olt, %4, %7 : vector<16x128xf32>
    %cst_5 = arith.constant 1.000000e+00 : f32
    %9 = vector.broadcast %cst_5 : f32 to vector<16x128xf32>
    %10 = arith.subf %9, %3 : vector<16x128xf32>
    %11 = arith.select %6, %3, %10 : vector<16x128xi1>, vector<16x128xf32>
    %12 = math.log %11 : vector<16x128xf32>
    %13 = arith.mulf %10, %10 : vector<16x128xf32>
    %14 = arith.mulf %12, %13 : vector<16x128xf32>
    %15 = arith.mulf %3, %3 : vector<16x128xf32>
    %16 = arith.mulf %12, %15 : vector<16x128xf32>
    %cst_6 = arith.constant 1.000000e+00 : f32
    %17 = vector.broadcast %cst_6 : f32 to vector<16x128xf32>
    %18 = arith.subf %17, %4 : vector<16x128xf32>
    %19 = arith.mulf %18, %18 : vector<16x128xf32>
    %20 = arith.mulf %19, %19 : vector<16x128xf32>
    %21 = arith.mulf %16, %20 : vector<16x128xf32>
    %cst_7 = arith.constant 0.000000e+00 : f32
    %22 = vector.broadcast %cst_7 : f32 to vector<16x128xf32>
    %23 = arith.select %8, %21, %22 : vector<16x128xi1>, vector<16x128xf32>
    %24 = arith.select %6, %14, %23 : vector<16x128xi1>, vector<16x128xf32>
    %cst_8 = arith.constant 1.000000e+00 : f32
    %cst_9 = arith.constant 0.000000e+00 : f32
    %25 = vector.broadcast %cst_8 : f32 to vector<16x128xf32>
    %26 = vector.broadcast %cst_9 : f32 to vector<16x128xf32>
    %27 = arith.select %6, %25, %26 : vector<16x128xi1>, vector<16x128xf32>
    %c0_10 = arith.constant 0 : index
    %c0_11 = arith.constant 0 : index
    %c0_12 = arith.constant 0 : index
    %c0_13 = arith.constant 0 : index
    %28 = vector.load %arg4[%c0_10, %c0_11, %c0_12, %c0_13] : memref<1x2x8x128xf32, #tpu.memory_space<vmem>>, vector<1x1x8x128xf32>
    %29 = vector.shape_cast %28 : vector<1x1x8x128xf32> to vector<8x128xf32>
    %30 = vector.shape_cast %24 : vector<16x128xf32> to vector<2x8x128xf32>
    %cst_14 = arith.constant dense<0.000000e+00> : vector<8x128xf32>
    %31 = vector.multi_reduction <add>, %30, %cst_14 [0] : vector<2x8x128xf32> to vector<8x128xf32>
    %32 = arith.addf %29, %31 : vector<8x128xf32>
    %c0_15 = arith.constant 0 : index
    %c0_16 = arith.constant 0 : index
    %c0_17 = arith.constant 0 : index
    %c0_18 = arith.constant 0 : index
    %33 = vector.load %arg4[%c0_15, %c0_16, %c0_17, %c0_18] : memref<1x2x8x128xf32, #tpu.memory_space<vmem>>, vector<1x1x8x128xf32>
    %34 = vector.shape_cast %33 : vector<1x1x8x128xf32> to vector<8x128xf32>
    %35 = vector.shape_cast %32 : vector<8x128xf32> to vector<1x1x8x128xf32>
    tpu.vector_store %arg4[%c0_15, %c0_16, %c0_17, %c0_18], %35 {strides = array<i32>} : memref<1x2x8x128xf32, #tpu.memory_space<vmem>>, vector<1x1x8x128xf32>,
    %c0_19 = arith.constant 0 : index
    %c1 = arith.constant 1 : index
    %c0_20 = arith.constant 0 : index
    %c0_21 = arith.constant 0 : index
    %36 = vector.load %arg4[%c0_19, %c1, %c0_20, %c0_21] : memref<1x2x8x128xf32, #tpu.memory_space<vmem>>, vector<1x1x8x128xf32>
    %37 = vector.shape_cast %36 : vector<1x1x8x128xf32> to vector<8x128xf32>
    %38 = vector.shape_cast %27 : vector<16x128xf32> to vector<2x8x128xf32>
    %cst_22 = arith.constant dense<0.000000e+00> : vector<8x128xf32>
    %39 = vector.multi_reduction <add>, %38, %cst_22 [0] : vector<2x8x128xf32> to vector<8x128xf32>
    %40 = arith.addf %37, %39 : vector<8x128xf32>
    %c0_23 = arith.constant 0 : index
    %c1_24 = arith.constant 1 : index
    %c0_25 = arith.constant 0 : index
    %c0_26 = arith.constant 0 : index
    %41 = vector.load %arg4[%c0_23, %c1_24, %c0_25, %c0_26] : memref<1x2x8x128xf32, #tpu.memory_space<vmem>>, vector<1x1x8x128xf32>
    %42 = vector.shape_cast %41 : vector<1x1x8x128xf32> to vector<8x128xf32>
    %43 = vector.shape_cast %40 : vector<8x128xf32> to vector<1x1x8x128xf32>
    tpu.vector_store %arg4[%c0_23, %c1_24, %c0_25, %c0_26], %43 {strides = array<i32>} : memref<1x2x8x128xf32, #tpu.memory_space<vmem>>, vector<1x1x8x128xf32>,
    return
  }
  func.func @transform_0(%arg0: i32, %arg1: i32) -> (i32, i32) {
    %c1_i32 = arith.constant 1 : i32
    %0 = arith.muli %arg0, %c1_i32 : i32
    %1 = arith.addi %0, %arg1 : i32
    %c0_i32 = arith.constant 0 : i32
    %2 = arith.minsi %1, %c0_i32 : i32
    %c0_i32_0 = arith.constant 0 : i32
    %c0_i32_1 = arith.constant 0 : i32
    return %2, %c0_i32_0 : i32, i32
  }
  func.func @transform_1(%arg0: i32, %arg1: i32) -> (i32, i32) {
    %c1_i32 = arith.constant 1 : i32
    %0 = arith.muli %arg0, %c1_i32 : i32
    %1 = arith.addi %0, %arg1 : i32
    %c0_i32 = arith.constant 0 : i32
    %2 = arith.minsi %1, %c0_i32 : i32
    %c0_i32_0 = arith.constant 0 : i32
    %c0_i32_1 = arith.constant 0 : i32
    return %2, %c0_i32_0 : i32, i32
  }
  func.func @transform_2(%arg0: i32, %arg1: i32) -> (i32, i32, i32, i32) {
    %c0_i32 = arith.constant 0 : i32
    %c0_i32_0 = arith.constant 0 : i32
    %c0_i32_1 = arith.constant 0 : i32
    %c0_i32_2 = arith.constant 0 : i32
    return %arg0, %c0_i32, %c0_i32_0, %c0_i32_1 : i32, i32, i32, i32
  }
}

</mosaic_0001>

<bundles_post_ra>
// kernel: tpu_custom_call.1
= control target key start
LH: loop header
LB: loop body
LE: loop exit
PB: predicated region body
PF: predicated region fallthrough
CT: control target
= control target key end

     0   :  { %7 = vsyncpa [#allocation3], 0  ;;  %s289_s0 = inlined_call_operand.hbm [shape: f32[16,128], index: 0, kind: input, shape index: {}]   ;;  %s290_s1 = inlined_call_operand.hbm [shape: f32[16,128], index: 1, kind: input, shape index: {}]   ;;  %s291_s2 = inlined_call_operand.hbm [shape: f32[1,2,8,128], index: 2, kind: output, shape index: {}]  }
   0x1   :  { %8 = vsyncpa [#allocation6], 0 }
   0x2   :  { %9 = vsyncpa [#allocation4], 0  ;;  %s217_s9 = smov [#allocation2]   ;;  %s145_s13 = scalar_lea.hbm %s289_s0, 256 }
   0x3   :  { %s21_s10 = sshll.u32 %s217_s9, 4  ;;  %p146_p0 = scmp.ne.s32.totalorder %s289_s0, %s145_s13  ;;  %s22_s10 = int_to_ptr.vmem [resolvable:$true] %s21_s10 }
   0x4   :  { %p149_p1 = scmp.lt.u32.totalorder %s145_s13, %s289_s0 }
   0x6   :  { %p151_p2 = pnand %p149_p1, %p146_p0 }
   0x8   :  { %154 = shalt.err (!%p151_p2)
}
   0x9   :  { %s155_s18 = scalar_lea.vmem %s22_s10, 256  ;;  %p160_p4 = scmp.lt.s32.totalorder %s22_s10, %s22_s10 }
   0xa   :  { %p156_p3 = scmp.ne.s32.totalorder %s22_s10, %s155_s18  ;;  %p161_p5 = scmp.lt.s32.totalorder %s155_s18, %s155_s18 }
   0xc   :  { %p162_p6 = por %p161_p5, %p160_p4 }
   0xe   :  { %p163_p7 = pnand %p162_p6, %p156_p3 }
  0x10   :  { %166 = shalt.err (!%p163_p7)
}
  0x11   :  { %s218_s19 = smov 128   ;;  %s219_s20 = smov 8  }
  0x12   :  { %27 = dma.hbm_to_vmem [thread:$0]  %s289_s0, 256, %s22_s10, [#allocation3], %s218_s19, %s218_s19, %s219_s20  }
  0x13   :  { %s220_s23 = smov [#allocation5]   ;;  %s167_s27 = scalar_lea.hbm %s290_s1, 256 }
  0x14   :  { %s39_s24 = sshll.u32 %s220_s23, 4  ;;  %p168_p8 = scmp.ne.s32.totalorder %s290_s1, %s167_s27  ;;  %s40_s24 = int_to_ptr.vmem [resolvable:$true] %s39_s24 }
  0x15   :  { %p171_p9 = scmp.lt.u32.totalorder %s167_s27, %s290_s1 }
  0x17   :  { %p173_p10 = pnand %p171_p9, %p168_p8 }
  0x19   :  { %176 = shalt.err (!%p173_p10)
}
  0x1a   :  { %s177_s4 = scalar_lea.vmem %s40_s24, 256  ;;  %p182_p12 = scmp.lt.s32.totalorder %s40_s24, %s40_s24 }
  0x1b   :  { %p178_p11 = scmp.ne.s32.totalorder %s40_s24, %s177_s4  ;;  %p183_p13 = scmp.lt.s32.totalorder %s177_s4, %s177_s4 }
  0x1d   :  { %p184_p0 = por %p183_p13, %p182_p12 }
  0x1f   :  { %p185_p1 = pnand %p184_p0, %p178_p11 }
  0x21   :  { %188 = shalt.err (!%p185_p1)
}
  0x22   :  { %45 = dma.hbm_to_vmem [thread:$0]  %s290_s1, 256, %s40_s24, [#allocation6], %s218_s19, %s218_s19, %s219_s20  }
  0x23   :  { %211 = dma.done.wait [#allocation3], 256  }
  0x24   :  { %212 = vsyncadd [#allocation3], 4294967040 }
  0x25   :  { %213 = dma.done.wait [#allocation6], 256  }
  0x26   :  { %214 = vsyncadd [#allocation6], 4294967040  ;;  %v66_v0 = vld [vmem:[#allocation2] sm:$0xff]  ;;  %v67_v1 = vld [vmem:[#allocation2 + $0x8] sm:$0xff]  ;;  %v221_v8 = vmov 0.0   ;;  %s222_s1 = smov [#allocation7]  }
  0x27   :  { %v68_v2 = vld [vmem:[#allocation5] sm:$0xff]  ;;  %v69_v3 = vld [vmem:[#allocation5 + $0x8] sm:$0xff]  ;;  %v74_v4 = vsub.f32 1.0, %v66_v0  ;;  %v75_v5 = vsub.f32 1.0, %v67_v1  ;;  %v86_v16 = vmul.f32 %v66_v0, %v66_v0  ;;  %v87_v19 = vmul.f32 %v67_v1, %v67_v1  ;;  %s118_s6 = sshll.u32 %s222_s1, 4  ;;  %s119_s6 = int_to_ptr.vmem [resolvable:$true] %s118_s6 }
  0x28   :  { %vm70_vm0 = vcmp.eq.f32.partialorder %v68_v2, 1.0  ;;  %vm71_vm1 = vcmp.eq.f32.partialorder %v69_v3, 1.0  ;;  %v90_v12 = vsub.f32 1.0, %v68_v2  ;;  %v91_v13 = vsub.f32 1.0, %v69_v3  ;;  %s189_s7 = scalar_lea.vmem %s119_s6, 256  ;;  %p194_p3 = scmp.lt.s32.totalorder %s119_s6, %s119_s6 }
  0x29   :  { %v76_v6 = vsel %vm70_vm0, %v66_v0, %v74_v4  ;;  %v77_v7 = vsel %vm71_vm1, %v67_v1, %v75_v5  ;;  %v102_v9 = vsel %vm70_vm0, 1.0, %v221_v8  ;;  %v103_v10 = vsel %vm71_vm1, 1.0, %v221_v8  ;;  %p190_p2 = scmp.ne.s32.totalorder %s119_s6, %s189_s7  ;;  %p195_p4 = scmp.lt.s32.totalorder %s189_s7, %s189_s7 }
  0x2a   :  { %141 = vlog2.f32 %v76_v6  ;;  %v110_v11 = vadd.f32 %v103_v10, %v102_v9  ;;  %v92_v14 = vmul.f32 %v90_v12, %v90_v12  ;;  %v93_v15 = vmul.f32 %v91_v13, %v91_v13 }
  0x2b   :  { %143 = vlog2.f32 %v77_v7  ;;  %v82_v18 = vmul.f32 %v74_v4, %v74_v4  ;;  %v83_v22 = vmul.f32 %v75_v5, %v75_v5  ;;  %vm72_vm2 = vcmp.lt.f32.partialorder %v68_v2, 1.0  ;;  %p196_p5 = por %p195_p4, %p194_p3 }
  0x2c   :  { %112 = vst [vmem:[#allocation7 + $0x8] sm:$0xff] %v110_v11  ;;  %v94_v23 = vmul.f32 %v92_v14, %v92_v14  ;;  %v95_v25 = vmul.f32 %v93_v15, %v93_v15  ;;  %vm73_vm3 = vcmp.lt.f32.partialorder %v69_v3, 1.0 }
  0x2d   :  { %p197_p6 = pnand %p196_p5, %p190_p2 }
  0x34   :  { %v142_v17 = vpop.eup %141 }
  0x35   :  { %v144_v20 = vpop.eup %143  ;;  %v79_v21 = vmul.f32 0.6931472, %v142_v17 }
  0x36   :  { %v81_v24 = vmul.f32 0.6931472, %v144_v20 }
  0x37   :  { %v88_v26 = vmul.f32 %v86_v16, %v79_v21  ;;  %v84_v27 = vmul.f32 %v82_v18, %v79_v21 }
  0x38   :  { %v89_v28 = vmul.f32 %v87_v19, %v81_v24  ;;  %v85_v29 = vmul.f32 %v83_v22, %v81_v24 }
  0x39   :  { %v96_v30 = vmul.f32 %v94_v23, %v88_v26 }
  0x3a   :  { %v97_v31 = vmul.f32 %v95_v25, %v89_v28 }
  0x3b   :  { %v98_v32 = vsel %vm72_vm2, %v96_v30, 0.0 }
  0x3c   :  { %v99_v33 = vsel %vm73_vm3, %v97_v31, 0.0  ;;  %v100_v34 = vsel %vm70_vm0, %v84_v27, %v98_v32 }
  0x3d   :  { %v101_v35 = vsel %vm71_vm1, %v85_v29, %v99_v33 }
  0x3e   :  { %v105_v36 = vadd.f32 %v101_v35, %v100_v34 }
  0x40   :  { %107 = vst [vmem:[#allocation7] sm:$0xff] %v105_v36 }
  0x41   :  { %200 = shalt.err (!%p197_p6)
}
  0x42   :  { %s201_s10 = scalar_lea.hbm %s291_s2, 256 }
  0x43   :  { %p202_p7 = scmp.ne.s32.totalorder %s291_s2, %s201_s10  ;;  %p205_p8 = scmp.lt.u32.totalorder %s201_s10, %s291_s2 }
  0x45   :  { %p207_p9 = pnand %p205_p8, %p202_p7 }
  0x47   :  { %210 = shalt.err (!%p207_p9)
}
  0x48   :  { %124 = dma.vmem_to_hbm [thread:$0]  %s119_s6, 256, %s291_s2, [#allocation4], %s218_s19, %s218_s19, %s219_s20  }
  0x49   :  { %215 = dma.done.wait [#allocation4], 256  }
  0x4a   :  { %216 = vsyncadd [#allocation4], 4294967040 }
  0x4b   :  { %128 = vsyncpa [#allocation3], 1 }
  0x4c   :  { %129 = vsyncpa [#allocation6], 1 }
  0x4d   :  { %130 = vsyncpa [#allocation4], 1 }

</bundles_post_ra>
